<compile_context>
chip_gen: v7x
topology: tpu7x:2x2x1
jax: 0.10.0
libtpu: 0.0.40
codegen_flags: <defaults>
</compile_context>

<pallas_src>
import functools
import math

import jax
import jax.numpy as jnp
from jax.experimental import pallas as pl
from jax.experimental.pallas import tpu as pltpu

_SQRT_2_OVER_PI = 0.7978845608028654
_K = 5  # Conv1d kernel size (fixed in the module)


def _gelu(x):
    # TODO(synk): PyTorch nn.GELU() default is the exact erf form; the tanh
    # approximation (pure VPU/EUP ops, guaranteed Mosaic lowering) differs by
    # at most ~1e-3.
    return 0.5 * x * (1.0 + jnp.tanh(_SQRT_2_OVER_PI * (x + 0.044715 * x * x * x)))


def _dpfn_kernel(x_ref, w12_ref, b12_ref, wconv_ref, bconv_ref,
                 gnw_ref, gnb_ref, a_ref, w3a_ref, w3b_ref, b3_ref,
                 o_ref, stack_ref, *, dilation, eps):
    Bt, T, D = x_ref.shape
    Hh = bconv_ref.shape[1]

    # ---- fused PW1 | PW2 : one (Bt*T, D) @ (D, 2*Hh) matmul + GELU ----------
    x = x_ref[...].reshape(Bt * T, D).astype(jnp.bfloat16)
    y12 = jnp.dot(x, w12_ref[...], preferred_element_type=jnp.float32) + b12_ref[...]
    y12 = _gelu(y12)
    y1 = y12[:, :Hh]                          # ffw branch   (Bt*T, Hh)
    y2b = y12[:, Hh:].reshape(Bt, T, Hh)      # conv branch  (Bt, T, Hh)

    # ---- dilated 'same' Conv1d as ONE matmul over stacked shifted taps ------
    # stack_ref column block k holds y2 shifted by (k-2)*dilation time steps
    # (zero where the shift runs off the sequence).  All slice bounds are
    # static.  Every row of every column block is (re)written each grid step,
    # so no stale data can leak across steps even with core-sharded batches.
    for k in range(_K):                       # static unroll
        s = (k - _K // 2) * dilation
        c0 = k * Hh
        lo, hi = max(0, -s), min(T, T - s)
        if hi <= lo:                          # tap never overlaps the sequence
            stack_ref[:, :, c0:c0 + Hh] = jnp.zeros((Bt, T, Hh), jnp.float32)
            continue
        if lo > 0:
            stack_ref[:, :lo, c0:c0 + Hh] = jnp.zeros((Bt, lo, Hh), jnp.float32)
        if hi < T:
            stack_ref[:, hi:, c0:c0 + Hh] = jnp.zeros((Bt, T - hi, Hh), jnp.float32)
        stack_ref[:, lo:hi, c0:c0 + Hh] = y2b[:, lo + s:hi + s, :]

    stacked = stack_ref[...].reshape(Bt * T, _K * Hh).astype(jnp.bfloat16)
    conv = (jnp.dot(stacked, wconv_ref[...], preferred_element_type=jnp.float32)
            + bconv_ref[...])                 # (Bt*T, Hh)

    # ---- GroupNorm(1, Hh): per batch element over (T, Hh), single pass ------
    convb = conv.reshape(Bt, T, Hh)
    inv_n = 1.0 / float(T * Hh)
    s1 = jnp.sum(jnp.sum(convb, axis=2, keepdims=True), axis=1, keepdims=True)
    s2 = jnp.sum(jnp.sum(convb * convb, axis=2, keepdims=True), axis=1, keepdims=True)
    mu = s1 * inv_n                                           # (Bt, 1, 1)
    var = s2 * inv_n - mu * mu
    w_eff = jax.lax.rsqrt(var + eps) * gnw_ref[...]           # (Bt, 1, Hh)
    b_eff = gnb_ref[...] - mu * w_eff                         # (Bt, 1, Hh)
    g = convb * w_eff + b_eff

    # ---- PReLU (per-channel slopes, matches nn.PReLU(hidden_dim//2)) --------
    dw = jnp.where(g >= 0.0, g, a_ref[...] * g).reshape(Bt * T, Hh)

    # ---- PW3 on the implicit concat([ffw, dw]) via split matmul -------------
    out = (jnp.dot(y1.astype(jnp.bfloat16), w3a_ref[...],
                   preferred_element_type=jnp.float32)
           + jnp.dot(dw.astype(jnp.bfloat16), w3b_ref[...],
                     preferred_element_type=jnp.float32)
           + b3_ref[...])
    o_ref[...] = out.reshape(Bt, T, D).astype(o_ref.dtype)


def pack_params(params):
    """Pre-pack (once) into kernel layout/dtypes: PW1|PW2 fused, conv weight
    flattened to (K*Hh, Hh), matmul weights in bf16, everything else f32."""
    Hh = params["w1"].shape[1]
    return dict(
        w12=jnp.concatenate([params["w1"], params["w2"]], axis=1).astype(jnp.bfloat16),
        b12=jnp.concatenate([params["b1"], params["b2"]], axis=1).astype(jnp.float32),
        wconv=params["wconv"].reshape(_K * Hh, Hh).astype(jnp.bfloat16),
        bconv=params["bconv"].astype(jnp.float32),
        gn_w=params["gn_w"].astype(jnp.float32),
        gn_b=params["gn_b"].astype(jnp.float32),
        prelu_a=params["prelu_a"].astype(jnp.float32),
        w3a=params["w3a"].astype(jnp.bfloat16),
        w3b=params["w3b"].astype(jnp.bfloat16),
        b3=params["b3"].astype(jnp.float32),
    )


def _vmem_limit_bytes():
    """Per-generation scoped-VMEM budget (v7x has 64 MiB physical, v5e/v6e 128)."""
    try:
        cap = int(getattr(pltpu.get_tpu_info(), "vmem_capacity_bytes",
                          64 * 1024 * 1024))
    except Exception:
        cap = 64 * 1024 * 1024
    return max(16 * 1024 * 1024, min(cap * 3 // 4, 100 * 1024 * 1024))


def _pick_bt(B, T, D, Hh, vmem_limit):
    """Largest divisor of B whose block fits ~half the VMEM budget (caps MXU
    rows at ~2K; bigger brings nothing once the systolic array is full)."""
    per_b = (2 * 2 * T * D * 4                 # x + out blocks, double-buffered
             + T * Hh * 4 * 8                  # ~8 live (T, Hh) f32 temporaries
             + T * _K * Hh * (4 + 2)           # stacked conv LHS (f32 scratch + bf16)
             + T * D * 4)                      # PW3 accumulator
    budget = vmem_limit // 2
    max_bt = max(1, budget // max(per_b, 1))
    max_bt = min(max_bt, max(1, 2048 // max(T, 1)), B)
    bt = 1
    for d in range(1, max_bt + 1):
        if B % d == 0:
            bt = d
    return bt


def dpfn_forward(x, packed, *, dilation, eps=1e-5, bt=None):
    """x: [B, T, dim] float32.  packed: output of pack_params."""
    B, T, D = x.shape
    Hh = packed["bconv"].shape[1]

    vmem_limit = _vmem_limit_bytes()
    if bt is None:
        bt = _pick_bt(B, T, D, Hh, vmem_limit)

    kernel = functools.partial(_dpfn_kernel, dilation=dilation, eps=eps)
    const2 = lambda b: (0, 0)

    return pl.pallas_call(
        kernel,
        out_shape=jax.ShapeDtypeStruct((B, T, D), x.dtype),
        grid_spec=pltpu.PrefetchScalarGridSpec(
            num_scalar_prefetch=0,
            grid=(B // bt,),
            in_specs=[
                pl.BlockSpec((bt, T, D), lambda b: (b, 0, 0)),   # x (batch block)
                pl.BlockSpec((D, 2 * Hh), const2),               # W1|W2 (bf16)
                pl.BlockSpec((1, 2 * Hh), const2),               # b1|b2
                pl.BlockSpec((_K * Hh, Hh), const2),             # conv weight (bf16)
                pl.BlockSpec((1, Hh), const2),                   # conv bias
                pl.BlockSpec((1, Hh), const2),                   # GroupNorm weight
                pl.BlockSpec((1, Hh), const2),                   # GroupNorm bias
                pl.BlockSpec((1, Hh), const2),                   # PReLU slopes
                pl.BlockSpec((Hh, D), const2),                   # W3 (ffw half, bf16)
                pl.BlockSpec((Hh, D), const2),                   # W3 (dw half, bf16)
                pl.BlockSpec((1, D), const2),                    # b3
            ],
            out_specs=pl.BlockSpec((bt, T, D), lambda b: (b, 0, 0)),
            scratch_shapes=[pltpu.VMEM((bt, T, _K * Hh), jnp.float32)],
        ),
        compiler_params=pltpu.CompilerParams(
            dimension_semantics=("parallel",),    # batch blocks are independent
            vmem_limit_bytes=vmem_limit,
        ),
    )(x, packed["w12"], packed["b12"], packed["wconv"], packed["bconv"],
      packed["gn_w"], packed["gn_b"], packed["prelu_a"],
      packed["w3a"], packed["w3b"], packed["b3"])


def _reference(x, p, *, dilation, eps=1e-5):
    """Pure-JAX f32 reference mirroring the PyTorch forward (inference mode)."""
    T = x.shape[1]
    y1 = _gelu(x @ p["w1"] + p["b1"])
    y2 = _gelu(x @ p["w2"] + p["b2"])
    pad = 2 * dilation
    y2p = jnp.pad(y2, ((0, 0), (pad, pad), (0, 0)))
    conv = jnp.zeros_like(y2) + p["bconv"]
    for k in range(_K):
        conv = conv + y2p[:, k * dilation:k * dilation + T, :] @ p["wconv"][k]
    mu = jnp.mean(conv, axis=(1, 2), keepdims=True)
    var = jnp.mean((conv - mu) ** 2, axis=(1, 2), keepdims=True)
    g = (conv - mu) * jax.lax.rsqrt(var + eps) * p["gn_w"] + p["gn_b"]
    dw = jnp.where(g >= 0.0, g, p["prelu_a"] * g)
    return y1 @ p["w3a"] + dw @ p["w3b"] + p["b3"]


if __name__ == "__main__":
    # Small shapes consistent with the module: batch=2, seq=16, dim=32,
    # hidden_dim=64, idx=1 (dilation=2), dropout=0 (inference).
    B, T, dim, hidden_dim, idx = 2, 16, 32, 64, 1
    Hh = hidden_dim // 2
    dilation = 2 ** idx

    key = jax.random.PRNGKey(0)
    keys = jax.random.split(key, 9)

    def uinit(k, shape, fan_in):
        lim = 1.0 / math.sqrt(fan_in)
        return jax.random.uniform(k, shape, jnp.float32, -lim, lim)

    x = jax.random.normal(keys[0], (B, T, dim), dtype=jnp.float32)

    # One Linear(hidden_dim, dim): split its [hidden_dim, dim] weight into the
    # ffw half and the dw half for the concat-free PW3.
    w3 = uinit(keys[7], (hidden_dim, dim), hidden_dim)

    params = dict(
        w1=uinit(keys[1], (dim, Hh), dim),             # Linear weights in [in, out]
        b1=uinit(keys[2], (1, Hh), dim),
        w2=uinit(keys[3], (dim, Hh), dim),
        b2=uinit(keys[4], (1, Hh), dim),
        # Conv1d weight stored as [k, c_in, c_out] (= torch weight.permute(2,1,0))
        wconv=uinit(keys[5], (_K, Hh, Hh), Hh * _K),
        bconv=uinit(keys[6], (1, Hh), Hh * _K),
        gn_w=jnp.ones((1, Hh), jnp.float32),           # GroupNorm default init
        gn_b=jnp.zeros((1, Hh), jnp.float32),
        prelu_a=jnp.full((1, Hh), 0.25, jnp.float32),  # PReLU default init
        w3a=w3[:Hh],
        w3b=w3[Hh:],
        b3=uinit(keys[8], (1, dim), hidden_dim),
    )

    packed = pack_params(params)
    out = dpfn_forward(x, packed, dilation=dilation)
    out = jax.block_until_ready(out)

    ref = _reference(x, params, dilation=dilation)
    assert out.shape == (B, T, dim)
    # Tolerance covers bf16 matmul operands (f32 accumulation) in the kernel.
    err = float(jnp.max(jnp.abs(out - ref)))
    assert jnp.allclose(out, ref, atol=3e-2, rtol=3e-2), \
        f"mismatch vs reference (max |err| = {err})"

    print("KERNEL_OK")
</pallas_src>

<mosaic_0001>
module attributes {stable_mosaic.version = 11 : i64} {
  func.func @_dpfn_kernel(%arg0: i32, %arg1: memref<2x16x32xf32, #tpu.memory_space<vmem>>, %arg2: memref<32x64xbf16, #tpu.memory_space<vmem>>, %arg3: memref<1x64xf32, #tpu.memory_space<vmem>>, %arg4: memref<160x32xbf16, #tpu.memory_space<vmem>>, %arg5: memref<1x32xf32, #tpu.memory_space<vmem>>, %arg6: memref<1x32xf32, #tpu.memory_space<vmem>>, %arg7: memref<1x32xf32, #tpu.memory_space<vmem>>, %arg8: memref<1x32xf32, #tpu.memory_space<vmem>>, %arg9: memref<32x32xbf16, #tpu.memory_space<vmem>>, %arg10: memref<32x32xbf16, #tpu.memory_space<vmem>>, %arg11: memref<1x32xf32, #tpu.memory_space<vmem>>, %arg12: memref<2x16x32xf32, #tpu.memory_space<vmem>>, %arg13: memref<2x16x160xf32, #tpu.memory_space<vmem>>) attributes {dimension_semantics = [#tpu.dimension_semantics<parallel>], iteration_bounds = array<i64: 1>, scalar_prefetch = 0 : i64, scratch_operands = 1 : i64, tpu.core_type = #tpu.core_type<tc>, window_params = [{transform_indices = @transform_0, window_bounds = array<i64: 2, 16, 32>}, {pipeline_mode = #tpu.pipeline_mode<synchronous>, transform_indices = @transform_1, window_bounds = array<i64: 32, 64>}, {pipeline_mode = #tpu.pipeline_mode<synchronous>, transform_indices = @transform_2, window_bounds = array<i64: 1, 64>}, {pipeline_mode = #tpu.pipeline_mode<synchronous>, transform_indices = @transform_3, window_bounds = array<i64: 160, 32>}, {pipeline_mode = #tpu.pipeline_mode<synchronous>, transform_indices = @transform_4, window_bounds = array<i64: 1, 32>}, {pipeline_mode = #tpu.pipeline_mode<synchronous>, transform_indices = @transform_5, window_bounds = array<i64: 1, 32>}, {pipeline_mode = #tpu.pipeline_mode<synchronous>, transform_indices = @transform_6, window_bounds = array<i64: 1, 32>}, {pipeline_mode = #tpu.pipeline_mode<synchronous>, transform_indices = @transform_7, window_bounds = array<i64: 1, 32>}, {pipeline_mode = #tpu.pipeline_mode<synchronous>, transform_indices = @transform_8, window_bounds = array<i64: 32, 32>}, {pipeline_mode = #tpu.pipeline_mode<synchronous>, transform_indices = @transform_9, window_bounds = array<i64: 32, 32>}, {pipeline_mode = #tpu.pipeline_mode<synchronous>, transform_indices = @transform_10, window_bounds = array<i64: 1, 32>}, {transform_indices = @transform_11, window_bounds = array<i64: 2, 16, 32>}]} {
    %c0 = arith.constant 0 : index
    %c0_0 = arith.constant 0 : index
    %c0_1 = arith.constant 0 : index
    %0 = vector.load %arg1[%c0, %c0_0, %c0_1] : memref<2x16x32xf32, #tpu.memory_space<vmem>>, vector<2x16x32xf32>
    %1 = vector.shape_cast %0 : vector<2x16x32xf32> to vector<32x32xf32>
    %2 = arith.truncf %1 : vector<32x32xf32> to vector<32x32xbf16>
    %c0_2 = arith.constant 0 : index
    %c0_3 = arith.constant 0 : index
    %3 = vector.load %arg2[%c0_2, %c0_3] : memref<32x64xbf16, #tpu.memory_space<vmem>>, vector<32x64xbf16>
    %cst = arith.constant dense<0.000000e+00> : vector<32x64xf32>
    %4 = tpu.matmul %2, %3, %cst {dimension_numbers = #tpu.dot_dimension_numbers<[1], [0], [0], [1], [0, 0, 1, 1], [], []>} : vector<32x32xbf16>, vector<32x64xbf16>, vector<32x64xf32> -> vector<32x64xf32>
    %c0_4 = arith.constant 0 : index
    %c0_5 = arith.constant 0 : index
    %5 = vector.load %arg3[%c0_4, %c0_5] : memref<1x64xf32, #tpu.memory_space<vmem>>, vector<1x64xf32>
    %6 = vector.broadcast %5 : vector<1x64xf32> to vector<32x64xf32>
    %7 = arith.addf %4, %6 : vector<32x64xf32>
    %cst_6 = arith.constant 5.000000e-01 : f32
    %8 = vector.broadcast %cst_6 : f32 to vector<32x64xf32>
    %9 = arith.mulf %8, %7 : vector<32x64xf32>
    %cst_7 = arith.constant 4.471500e-02 : f32
    %10 = vector.broadcast %cst_7 : f32 to vector<32x64xf32>
    %11 = arith.mulf %10, %7 : vector<32x64xf32>
    %12 = arith.mulf %11, %7 : vector<32x64xf32>
    %13 = arith.mulf %12, %7 : vector<32x64xf32>
    %14 = arith.addf %7, %13 : vector<32x64xf32>
    %cst_8 = arith.constant 0.797884583 : f32
    %15 = vector.broadcast %cst_8 : f32 to vector<32x64xf32>
    %16 = arith.mulf %15, %14 : vector<32x64xf32>
    %17 = math.tanh %16 : vector<32x64xf32>
    %cst_9 = arith.constant 1.000000e+00 : f32
    %18 = vector.broadcast %cst_9 : f32 to vector<32x64xf32>
    %19 = arith.addf %18, %17 : vector<32x64xf32>
    %20 = arith.mulf %9, %19 : vector<32x64xf32>
    %21 = vector.extract_strided_slice %20 {offsets = [0, 0], sizes = [32, 32], strides = [1, 1]} : vector<32x64xf32> to vector<32x32xf32>
    %22 = vector.extract_strided_slice %20 {offsets = [0, 32], sizes = [32, 32], strides = [1, 1]} : vector<32x64xf32> to vector<32x32xf32>
    %23 = vector.shape_cast %22 : vector<32x32xf32> to vector<2x16x32xf32>
    %cst_10 = arith.constant 0.000000e+00 : f32
    %24 = vector.broadcast %cst_10 : f32 to vector<2x4x32xf32>
    %c0_11 = arith.constant 0 : index
    %c0_12 = arith.constant 0 : index
    %c0_13 = arith.constant 0 : index
    %25 = vector.load %arg13[%c0_11, %c0_12, %c0_13] : memref<2x16x160xf32, #tpu.memory_space<vmem>>, vector<2x4x32xf32>
    tpu.vector_store %arg13[%c0_11, %c0_12, %c0_13], %24 {strides = array<i32>} : memref<2x16x160xf32, #tpu.memory_space<vmem>>, vector<2x4x32xf32>,
    %26 = vector.extract_strided_slice %23 {offsets = [0, 0, 0], sizes = [2, 12, 32], strides = [1, 1, 1]} : vector<2x16x32xf32> to vector<2x12x32xf32>
    %c0_14 = arith.constant 0 : index
    %c4 = arith.constant 4 : index
    %c0_15 = arith.constant 0 : index
    %27 = vector.load %arg13[%c0_14, %c4, %c0_15] : memref<2x16x160xf32, #tpu.memory_space<vmem>>, vector<2x12x32xf32>
    tpu.vector_store %arg13[%c0_14, %c4, %c0_15], %26 {strides = array<i32>} : memref<2x16x160xf32, #tpu.memory_space<vmem>>, vector<2x12x32xf32>,
    %cst_16 = arith.constant 0.000000e+00 : f32
    %28 = vector.broadcast %cst_16 : f32 to vector<2x2x32xf32>
    %c0_17 = arith.constant 0 : index
    %c0_18 = arith.constant 0 : index
    %c32 = arith.constant 32 : index
    %29 = vector.load %arg13[%c0_17, %c0_18, %c32] : memref<2x16x160xf32, #tpu.memory_space<vmem>>, vector<2x2x32xf32>
    tpu.vector_store %arg13[%c0_17, %c0_18, %c32], %28 {strides = array<i32>} : memref<2x16x160xf32, #tpu.memory_space<vmem>>, vector<2x2x32xf32>,
    %30 = vector.extract_strided_slice %23 {offsets = [0, 0, 0], sizes = [2, 14, 32], strides = [1, 1, 1]} : vector<2x16x32xf32> to vector<2x14x32xf32>
    %c0_19 = arith.constant 0 : index
    %c2 = arith.constant 2 : index
    %c32_20 = arith.constant 32 : index
    %31 = vector.load %arg13[%c0_19, %c2, %c32_20] : memref<2x16x160xf32, #tpu.memory_space<vmem>>, vector<2x14x32xf32>
    tpu.vector_store %arg13[%c0_19, %c2, %c32_20], %30 {strides = array<i32>} : memref<2x16x160xf32, #tpu.memory_space<vmem>>, vector<2x14x32xf32>,
    %c0_21 = arith.constant 0 : index
    %c0_22 = arith.constant 0 : index
    %c64 = arith.constant 64 : index
    %32 = vector.load %arg13[%c0_21, %c0_22, %c64] : memref<2x16x160xf32, #tpu.memory_space<vmem>>, vector<2x16x32xf32>
    tpu.vector_store %arg13[%c0_21, %c0_22, %c64], %23 {strides = array<i32>} : memref<2x16x160xf32, #tpu.memory_space<vmem>>, vector<2x16x32xf32>,
    %cst_23 = arith.constant 0.000000e+00 : f32
    %33 = vector.broadcast %cst_23 : f32 to vector<2x2x32xf32>
    %c0_24 = arith.constant 0 : index
    %c14 = arith.constant 14 : index
    %c96 = arith.constant 96 : index
    %34 = vector.load %arg13[%c0_24, %c14, %c96] : memref<2x16x160xf32, #tpu.memory_space<vmem>>, vector<2x2x32xf32>
    tpu.vector_store %arg13[%c0_24, %c14, %c96], %33 {strides = array<i32>} : memref<2x16x160xf32, #tpu.memory_space<vmem>>, vector<2x2x32xf32>,
    %35 = vector.extract_strided_slice %23 {offsets = [0, 2, 0], sizes = [2, 14, 32], strides = [1, 1, 1]} : vector<2x16x32xf32> to vector<2x14x32xf32>
    %c0_25 = arith.constant 0 : index
    %c0_26 = arith.constant 0 : index
    %c96_27 = arith.constant 96 : index
    %36 = vector.load %arg13[%c0_25, %c0_26, %c96_27] : memref<2x16x160xf32, #tpu.memory_space<vmem>>, vector<2x14x32xf32>
    tpu.vector_store %arg13[%c0_25, %c0_26, %c96_27], %35 {strides = array<i32>} : memref<2x16x160xf32, #tpu.memory_space<vmem>>, vector<2x14x32xf32>,
    %cst_28 = arith.constant 0.000000e+00 : f32
    %37 = vector.broadcast %cst_28 : f32 to vector<2x4x32xf32>
    %c0_29 = arith.constant 0 : index
    %c12 = arith.constant 12 : index
    %c128 = arith.constant 128 : index
    %38 = vector.load %arg13[%c0_29, %c12, %c128] : memref<2x16x160xf32, #tpu.memory_space<vmem>>, vector<2x4x32xf32>
    tpu.vector_store %arg13[%c0_29, %c12, %c128], %37 {strides = array<i32>} : memref<2x16x160xf32, #tpu.memory_space<vmem>>, vector<2x4x32xf32>,
    %39 = vector.extract_strided_slice %23 {offsets = [0, 4, 0], sizes = [2, 12, 32], strides = [1, 1, 1]} : vector<2x16x32xf32> to vector<2x12x32xf32>
    %c0_30 = arith.constant 0 : index
    %c0_31 = arith.constant 0 : index
    %c128_32 = arith.constant 128 : index
    %40 = vector.load %arg13[%c0_30, %c0_31, %c128_32] : memref<2x16x160xf32, #tpu.memory_space<vmem>>, vector<2x12x32xf32>
    tpu.vector_store %arg13[%c0_30, %c0_31, %c128_32], %39 {strides = array<i32>} : memref<2x16x160xf32, #tpu.memory_space<vmem>>, vector<2x12x32xf32>,
    %c0_33 = arith.constant 0 : index
    %c0_34 = arith.constant 0 : index
    %c0_35 = arith.constant 0 : index
    %41 = vector.load %arg13[%c0_33, %c0_34, %c0_35] : memref<2x16x160xf32, #tpu.memory_space<vmem>>, vector<2x16x160xf32>
    %42 = vector.shape_cast %41 : vector<2x16x160xf32> to vector<32x160xf32>
    %43 = arith.truncf %42 : vector<32x160xf32> to vector<32x160xbf16>
    %c0_36 = arith.constant 0 : index
    %c0_37 = arith.constant 0 : index
    %44 = vector.load %arg4[%c0_36, %c0_37] : memref<160x32xbf16, #tpu.memory_space<vmem>>, vector<160x32xbf16>
    %cst_38 = arith.constant dense<0.000000e+00> : vector<32x32xf32>
    %45 = tpu.matmul %43, %44, %cst_38 {dimension_numbers = #tpu.dot_dimension_numbers<[1], [0], [0], [1], [0, 0, 1, 1], [], []>} : vector<32x160xbf16>, vector<160x32xbf16>, vector<32x32xf32> -> vector<32x32xf32>
    %c0_39 = arith.constant 0 : index
    %c0_40 = arith.constant 0 : index
    %46 = vector.load %arg5[%c0_39, %c0_40] : memref<1x32xf32, #tpu.memory_space<vmem>>, vector<1x32xf32>
    %47 = vector.broadcast %46 : vector<1x32xf32> to vector<32x32xf32>
    %48 = arith.addf %45, %47 : vector<32x32xf32>
    %49 = vector.shape_cast %48 : vector<32x32xf32> to vector<2x16x32xf32>
    %cst_41 = arith.constant dense<0.000000e+00> : vector<2x16xf32>
    %50 = vector.multi_reduction <add>, %49, %cst_41 [2] : vector<2x16x32xf32> to vector<2x16xf32>
    %51 = vector.shape_cast %50 : vector<2x16xf32> to vector<2x16x1xf32>
    %cst_42 = arith.constant dense<0.000000e+00> : vector<2x1xf32>
    %52 = vector.multi_reduction <add>, %51, %cst_42 [1] : vector<2x16x1xf32> to vector<2x1xf32>
    %53 = vector.shape_cast %52 : vector<2x1xf32> to vector<2x1x1xf32>
    %54 = arith.mulf %49, %49 : vector<2x16x32xf32>
    %cst_43 = arith.constant dense<0.000000e+00> : vector<2x16xf32>
    %55 = vector.multi_reduction <add>, %54, %cst_43 [2] : vector<2x16x32xf32> to vector<2x16xf32>
    %56 = vector.shape_cast %55 : vector<2x16xf32> to vector<2x16x1xf32>
    %cst_44 = arith.constant dense<0.000000e+00> : vector<2x1xf32>
    %57 = vector.multi_reduction <add>, %56, %cst_44 [1] : vector<2x16x1xf32> to vector<2x1xf32>
    %58 = vector.shape_cast %57 : vector<2x1xf32> to vector<2x1x1xf32>
    %cst_45 = arith.constant 0.001953125 : f32
    %59 = vector.broadcast %cst_45 : f32 to vector<2x1x1xf32>
    %60 = arith.mulf %53, %59 : vector<2x1x1xf32>
    %cst_46 = arith.constant 0.001953125 : f32
    %61 = vector.broadcast %cst_46 : f32 to vector<2x1x1xf32>
    %62 = arith.mulf %58, %61 : vector<2x1x1xf32>
    %63 = arith.mulf %60, %60 : vector<2x1x1xf32>
    %64 = arith.subf %62, %63 : vector<2x1x1xf32>
    %cst_47 = arith.constant 9.99999974E-6 : f32
    %65 = vector.broadcast %cst_47 : f32 to vector<2x1x1xf32>
    %66 = arith.addf %64, %65 : vector<2x1x1xf32>
    %67 = math.rsqrt %66 : vector<2x1x1xf32>
    %c0_48 = arith.constant 0 : index
    %c0_49 = arith.constant 0 : index
    %68 = vector.load %arg6[%c0_48, %c0_49] : memref<1x32xf32, #tpu.memory_space<vmem>>, vector<1x32xf32>
    %69 = vector.shape_cast %68 : vector<1x32xf32> to vector<1x1x32xf32>
    %70 = vector.broadcast %67 : vector<2x1x1xf32> to vector<2x1x32xf32>
    %71 = vector.broadcast %69 : vector<1x1x32xf32> to vector<2x1x32xf32>
    %72 = arith.mulf %70, %71 : vector<2x1x32xf32>
    %c0_50 = arith.constant 0 : index
    %c0_51 = arith.constant 0 : index
    %73 = vector.load %arg7[%c0_50, %c0_51] : memref<1x32xf32, #tpu.memory_space<vmem>>, vector<1x32xf32>
    %74 = vector.broadcast %60 : vector<2x1x1xf32> to vector<2x1x32xf32>
    %75 = arith.mulf %74, %72 : vector<2x1x32xf32>
    %76 = vector.shape_cast %73 : vector<1x32xf32> to vector<1x1x32xf32>
    %77 = vector.broadcast %76 : vector<1x1x32xf32> to vector<2x1x32xf32>
    %78 = arith.subf %77, %75 : vector<2x1x32xf32>
    %79 = vector.broadcast %72 : vector<2x1x32xf32> to vector<2x16x32xf32>
    %80 = arith.mulf %49, %79 : vector<2x16x32xf32>
    %81 = vector.broadcast %78 : vector<2x1x32xf32> to vector<2x16x32xf32>
    %82 = arith.addf %80, %81 : vector<2x16x32xf32>
    %cst_52 = arith.constant 0.000000e+00 : f32
    %83 = vector.broadcast %cst_52 : f32 to vector<2x16x32xf32>
    %84 = arith.cmpf oge, %82, %83 : vector<2x16x32xf32>
    %c0_53 = arith.constant 0 : index
    %c0_54 = arith.constant 0 : index
    %85 = vector.load %arg8[%c0_53, %c0_54] : memref<1x32xf32, #tpu.memory_space<vmem>>, vector<1x32xf32>
    %86 = vector.shape_cast %85 : vector<1x32xf32> to vector<1x1x32xf32>
    %87 = vector.broadcast %86 : vector<1x1x32xf32> to vector<2x16x32xf32>
    %88 = arith.mulf %87, %82 : vector<2x16x32xf32>
    %89 = arith.select %84, %82, %88 : vector<2x16x32xi1>, vector<2x16x32xf32>
    %90 = vector.shape_cast %89 : vector<2x16x32xf32> to vector<32x32xf32>
    %91 = arith.truncf %21 : vector<32x32xf32> to vector<32x32xbf16>
    %c0_55 = arith.constant 0 : index
    %c0_56 = arith.constant 0 : index
    %92 = vector.load %arg9[%c0_55, %c0_56] : memref<32x32xbf16, #tpu.memory_space<vmem>>, vector<32x32xbf16>
    %cst_57 = arith.constant dense<0.000000e+00> : vector<32x32xf32>
    %93 = tpu.matmul %91, %92, %cst_57 {dimension_numbers = #tpu.dot_dimension_numbers<[1], [0], [0], [1], [0, 0, 1, 1], [], []>} : vector<32x32xbf16>, vector<32x32xbf16>, vector<32x32xf32> -> vector<32x32xf32>
    %94 = arith.truncf %90 : vector<32x32xf32> to vector<32x32xbf16>
    %c0_58 = arith.constant 0 : index
    %c0_59 = arith.constant 0 : index
    %95 = vector.load %arg10[%c0_58, %c0_59] : memref<32x32xbf16, #tpu.memory_space<vmem>>, vector<32x32xbf16>
    %cst_60 = arith.constant dense<0.000000e+00> : vector<32x32xf32>
    %96 = tpu.matmul %94, %95, %cst_60 {dimension_numbers = #tpu.dot_dimension_numbers<[1], [0], [0], [1], [0, 0, 1, 1], [], []>} : vector<32x32xbf16>, vector<32x32xbf16>, vector<32x32xf32> -> vector<32x32xf32>
    %97 = arith.addf %93, %96 : vector<32x32xf32>
    %c0_61 = arith.constant 0 : index
    %c0_62 = arith.constant 0 : index
    %98 = vector.load %arg11[%c0_61, %c0_62] : memref<1x32xf32, #tpu.memory_space<vmem>>, vector<1x32xf32>
    %99 = vector.broadcast %98 : vector<1x32xf32> to vector<32x32xf32>
    %100 = arith.addf %97, %99 : vector<32x32xf32>
    %101 = vector.shape_cast %100 : vector<32x32xf32> to vector<2x16x32xf32>
    %c0_63 = arith.constant 0 : index
    %c0_64 = arith.constant 0 : index
    %c0_65 = arith.constant 0 : index
    %102 = vector.load %arg12[%c0_63, %c0_64, %c0_65] : memref<2x16x32xf32, #tpu.memory_space<vmem>>, vector<2x16x32xf32>
    tpu.vector_store %arg12[%c0_63, %c0_64, %c0_65], %101 {strides = array<i32>} : memref<2x16x32xf32, #tpu.memory_space<vmem>>, vector<2x16x32xf32>,
    return
  }
  func.func @transform_0(%arg0: i32) -> (i32, i32, i32) {
    %c0_i32 = arith.constant 0 : i32
    %c0_i32_0 = arith.constant 0 : i32
    %c0_i32_1 = arith.constant 0 : i32
    return %arg0, %c0_i32, %c0_i32_0 : i32, i32, i32
  }
  func.func @transform_1(%arg0: i32) -> (i32, i32) {
    %c0_i32 = arith.constant 0 : i32
    %c0_i32_0 = arith.constant 0 : i32
    %c0_i32_1 = arith.constant 0 : i32
    return %c0_i32, %c0_i32_0 : i32, i32
  }
  func.func @transform_2(%arg0: i32) -> (i32, i32) {
    %c0_i32 = arith.constant 0 : i32
    %c0_i32_0 = arith.constant 0 : i32
    %c0_i32_1 = arith.constant 0 : i32
    return %c0_i32, %c0_i32_0 : i32, i32
  }
  func.func @transform_3(%arg0: i32) -> (i32, i32) {
    %c0_i32 = arith.constant 0 : i32
    %c0_i32_0 = arith.constant 0 : i32
    %c0_i32_1 = arith.constant 0 : i32
    return %c0_i32, %c0_i32_0 : i32, i32
  }
  func.func @transform_4(%arg0: i32) -> (i32, i32) {
    %c0_i32 = arith.constant 0 : i32
    %c0_i32_0 = arith.constant 0 : i32
    %c0_i32_1 = arith.constant 0 : i32
    return %c0_i32, %c0_i32_0 : i32, i32
  }
  func.func @transform_5(%arg0: i32) -> (i32, i32) {
    %c0_i32 = arith.constant 0 : i32
    %c0_i32_0 = arith.constant 0 : i32
    %c0_i32_1 = arith.constant 0 : i32
    return %c0_i32, %c0_i32_0 : i32, i32
  }
  func.func @transform_6(%arg0: i32) -> (i32, i32) {
    %c0_i32 = arith.constant 0 : i32
    %c0_i32_0 = arith.constant 0 : i32
    %c0_i32_1 = arith.constant 0 : i32
    return %c0_i32, %c0_i32_0 : i32, i32
  }
  func.func @transform_7(%arg0: i32) -> (i32, i32) {
    %c0_i32 = arith.constant 0 : i32
    %c0_i32_0 = arith.constant 0 : i32
    %c0_i32_1 = arith.constant 0 : i32
    return %c0_i32, %c0_i32_0 : i32, i32
  }
  func.func @transform_8(%arg0: i32) -> (i32, i32) {
    %c0_i32 = arith.constant 0 : i32
    %c0_i32_0 = arith.constant 0 : i32
    %c0_i32_1 = arith.constant 0 : i32
    return %c0_i32, %c0_i32_0 : i32, i32
  }
  func.func @transform_9(%arg0: i32) -> (i32, i32) {
    %c0_i32 = arith.constant 0 : i32
    %c0_i32_0 = arith.constant 0 : i32
    %c0_i32_1 = arith.constant 0 : i32
    return %c0_i32, %c0_i32_0 : i32, i32
  }
  func.func @transform_10(%arg0: i32) -> (i32, i32) {
    %c0_i32 = arith.constant 0 : i32
    %c0_i32_0 = arith.constant 0 : i32
    %c0_i32_1 = arith.constant 0 : i32
    return %c0_i32, %c0_i32_0 : i32, i32
  }
  func.func @transform_11(%arg0: i32) -> (i32, i32, i32) {
    %c0_i32 = arith.constant 0 : i32
    %c0_i32_0 = arith.constant 0 : i32
    %c0_i32_1 = arith.constant 0 : i32
    return %arg0, %c0_i32, %c0_i32_0 : i32, i32, i32
  }
}

</mosaic_0001>

<bundles_post_ra>
// kernel: tpu_custom_call.1
= control target key start
LH: loop header
LB: loop body
LE: loop exit
PB: predicated region body
PF: predicated region fallthrough
CT: control target
= control target key end

     0   :  { %vm69_vm0 = vcmask 261120   ;;  %s1147_s0 = inlined_call_operand.vmem [shape: f32[2,16,32], index: 0, kind: input, shape index: {}]   ;;  %s1148_s1 = inlined_call_operand.vmem [shape: bf16[32,64], index: 1, kind: input, shape index: {}]   ;;  %s1149_s2 = inlined_call_operand.vmem [shape: f32[1,64], index: 2, kind: input, shape index: {}]   ;;  %s1150_s3 = inlined_call_operand.vmem [shape: bf16[160,32], index: 3, kind: input, shape index: {}]   ;;  %s1151_s4 = inlined_call_operand.vmem [shape: f32[1,32], index: 4, kind: input, shape index: {}]   ;;  %s1152_s5 = inlined_call_operand.vmem [shape: f32[1,32], index: 5, kind: input, shape index: {}]   ;;  %s1153_s6 = inlined_call_operand.vmem [shape: f32[1,32], index: 6, kind: input, shape index: {}]   ;;  %s1154_s7 = inlined_call_operand.vmem [shape: f32[1,32], index: 7, kind: input, shape index: {}]   ;;  %s1155_s8 = inlined_call_operand.vmem [shape: bf16[32,32], index: 8, kind: input, shape index: {}]   ;;  %s1156_s9 = inlined_call_operand.vmem [shape: bf16[32,32], index: 9, kind: input, shape index: {}]   ;;  %s1157_s10 = inlined_call_operand.vmem [shape: f32[1,32], index: 10, kind: input, shape index: {}]   ;;  %s1158_s11 = inlined_call_operand.hbm [shape: f32[2,16,32], index: 11, kind: output, shape index: {}]  }
   0x1   :  { %v803_v0 = vld [vmem:[%s1148_s1] sm:$0xff]   ;;  %v804_v1 = vld [vmem:[%s1148_s1 + $0x8] sm:$0xff]   ;;  %v42_v4 = vld [vmem:[%s1147_s0 + $0x10] sm:$0xff] }
   0x2   :  { %767 = vmatprep.subr.bf16.mxu0 %v803_v0  ;;  %v40_v2 = vld [vmem:[%s1147_s0] sm:$0xff]  ;;  %v41_v3 = vld [vmem:[%s1147_s0 + $0x8] sm:$0xff]  ;;  %v43_v6 = vld [vmem:[%s1147_s0 + $0x18] sm:$0xff] }
   0x3   :  { %768 = vmatpush3.bf16.msra.mxu0 %v803_v0  ;;  %v44_v5 = vpack.c.bf16 %v41_v3, %v40_v2  ;;  %v45_v7 = vpack.c.bf16 %v43_v6, %v42_v4 }
   0x4   :  { %769 = vmatprep.subr.bf16.mxu0 %v804_v1 }
   0x5   :  { %771 = vmatprep.mubr.msk.bf16.mxu0 %vm69_vm0, %v44_v5 }
   0x7   :  { %770 = vmatpush3.bf16.msra.mxu0 %v804_v1 }
   0xa   :  { %772 = vmatmul.mubr.msk.bf16.vlgmr.msra.gmra.mrb[0].mxu0 %vm69_vm0, %v45_v7 }
   0xb   :  { %16 = vsyncpa [#allocation4], 0  ;;  %v805_v8 = vld [vmem:[%s1150_s3] sm:$0xff]   ;;  %v855_v9 = vmov 0   ;;  %v806_v10 = vld [vmem:[%s1150_s3 + $0x8] sm:$0xff]   ;;  %vm161_vm1 = vcmask 257024  }
   0xc   :  { %374 = vmatprep.subr.bf16.mxu1 %v855_v9  ;;  %v807_v11 = vld [vmem:[%s1150_s3 + $0x10] sm:$0xff]   ;;  %v727_v12 = vld [vmem:[%s1149_s2] ss:$0 sm:$0xff]  ;;  %v808_v41 = vld [vmem:[%s1150_s3 + $0x18] sm:$0xff]   ;;  %vm187_vm2 = vcmask 261124   ;;  %v856_v42 = vmov 0.0  }
   0xd   :  { %375 = vmatpush1.bf16.msra.mxu1 %v805_v8  ;;  %162 = vst.msk [vmem:[#allocation2] sm:$0xf] %vm161_vm1, %v856_v42  ;;  %163 = vst.msk [vmem:[#allocation2 + $0x20] sm:$0xf] %vm161_vm1, %v856_v42  ;;  %v809_v43 = vld [vmem:[%s1150_s3 + $0x20] sm:$0xff]   ;;  %vm192_vm3 = vcmask 517376  }
   0xe   :  { %376 = vmatprep.subr.bf16.mxu1 %v855_v9  ;;  %257 = vst.msk [vmem:[#allocation2 + $0x18] sm:$0xf0] %vm187_vm2, %v856_v42  ;;  %258 = vst.msk [vmem:[#allocation2 + $0x38] sm:$0xf0] %vm187_vm2, %v856_v42  ;;  %v810_v44 = vld [vmem:[%s1150_s3 + $0x28] sm:$0xff]   ;;  %v811_v56 = vld [vmem:[%s1150_s3 + $0x30] sm:$0xff]  }
   0xf   :  { %194 = vst.msk [vmem:[#allocation2 + $0x20] sm:$0x3] %vm192_vm3, %v856_v42  ;;  %193 = vst.msk [vmem:[#allocation2] sm:$0x3] %vm192_vm3, %v856_v42  ;;  %vm168_vm4 = vcmask 1043456   ;;  %vm232_vm5 = vcmask 1045504  }
  0x10   :  { %vm195_vm6 = vcmask 1041408   ;;  %s857_s23 = smov 32   ;;  %v812_v5 = vld [vmem:[%s1150_s3 + $0x38] sm:$0xff]   ;;  %s858_s26 = smov 96   ;;  %vm206_vm7 = vcmask 523522   ;;  %vm224_vm8 = vcmask 785920  }
  0x11   :  { %377 = vmatpush1.bf16.msra.mxu1 %v806_v10  ;;  %s859_s30 = smov 64   ;;  %vm208_vm9 = vcmask 523520   ;;  %vm251_vm10 = vcmask 1048320   ;;  %vm229_vm11 = vcmask 1048326   ;;  %vm253_vm12 = vcmask 1046272  }
  0x12   :  { %378 = vmatprep.subr.bf16.mxu1 %v855_v9 }
  0x15   :  { %379 = vmatpush1.bf16.msra.mxu1 %v807_v11 }
  0x16   :  { %380 = vmatprep.subr.bf16.mxu1 %v855_v9 }
  0x19   :  { %381 = vmatpush1.bf16.msra.mxu1 %v808_v41 }
  0x1a   :  { %382 = vmatprep.subr.bf16.mxu1 %v855_v9 }
  0x1d   :  { %383 = vmatpush1.bf16.msra.mxu1 %v809_v43 }
  0x1e   :  { %384 = vmatprep.subr.bf16.mxu1 %v855_v9 }
  0x21   :  { %385 = vmatpush1.bf16.msra.mxu1 %v810_v44 }
  0x22   :  { %386 = vmatprep.subr.bf16.mxu1 %v855_v9 }
  0x25   :  { %387 = vmatpush1.bf16.msra.mxu1 %v811_v56 }
  0x26   :  { %388 = vmatprep.subr.bf16.mxu1 %v855_v9 }
  0x29   :  { %389 = vmatpush1.bf16.msra.mxu1 %v812_v5 }
  0x2a   :  { %390 = vmatprep.subr.bf16.mxu1 %v855_v9 }
  0xdd   :  { %v773_v13 = vpop.f32.mrb[0].mxu0 }
  0xde   :  { %v119_v14 = vadd.f32 %v773_v13, %v727_v12  ;;  %v110_v15 = vpop.f32.mrb[1].mxu0 }
  0xdf   :  { %v111_v16 = vadd.f32 %v727_v12, %v110_v15  ;;  %v774_v17 = vpop.f32.mrb[2].mxu0 }
  0xe0   :  { %v131_v18 = vmul.f32 0.044715, %v119_v14  ;;  %v122_v19 = vadd.f32 %v774_v17, %v727_v12  ;;  %v113_v20 = vpop.f32.mrb[3].mxu0  ;;  %v127_v47 = vmul.f32 0.5, %v119_v14 }
  0xe1   :  { %v129_v21 = vmul.f32 0.044715, %v111_v16  ;;  %v114_v22 = vadd.f32 %v727_v12, %v113_v20  ;;  %v125_v50 = vmul.f32 0.5, %v111_v16 }
  0xe2   :  { %v135_v23 = vmul.f32 %v131_v18, %v119_v14  ;;  %v132_v24 = vmul.f32 0.044715, %v122_v19  ;;  %v128_v54 = vmul.f32 0.5, %v122_v19  ;;  %v813_v18 = vld [vmem:[%s1150_s3 + $0x40] sm:$0xff]  }
  0xe3   :  { %v133_v25 = vmul.f32 %v129_v21, %v111_v16  ;;  %v130_v26 = vmul.f32 0.044715, %v114_v22  ;;  %v126_v57 = vmul.f32 0.5, %v114_v22  ;;  %391 = vmatpush1.bf16.msra.mxu1 %v813_v18  ;;  %v814_v21 = vld [vmem:[%s1150_s3 + $0x48] sm:$0xff]  }
  0xe4   :  { %v139_v27 = vmul.f32 %v135_v23, %v119_v14  ;;  %v136_v28 = vmul.f32 %v132_v24, %v122_v19  ;;  %392 = vmatprep.subr.bf16.mxu1 %v855_v9 }
  0xe5   :  { %v137_v29 = vmul.f32 %v133_v25, %v111_v16  ;;  %v134_v30 = vmul.f32 %v130_v26, %v114_v22 }
  0xe6   :  { %v143_v31 = vadd.f32 %v139_v27, %v119_v14  ;;  %v140_v32 = vmul.f32 %v136_v28, %v122_v19 }
  0xe7   :  { %v141_v33 = vadd.f32 %v137_v29, %v111_v16  ;;  %v138_v34 = vmul.f32 %v134_v30, %v114_v22  ;;  %393 = vmatpush1.bf16.msra.mxu1 %v814_v21 }
  0xe8   :  { %v147_v35 = vmul.f32 0.7978846, %v143_v31  ;;  %v144_v36 = vadd.f32 %v140_v32, %v122_v19 }
  0xe9   :  { %v145_v37 = vmul.f32 0.7978846, %v141_v33  ;;  %v142_v38 = vadd.f32 %v138_v34, %v114_v22 }
  0xea   :  { %819 = vtanh.f32 %v147_v35  ;;  %v148_v39 = vmul.f32 0.7978846, %v144_v36 }
  0xeb   :  { %821 = vtanh.f32 %v145_v37  ;;  %v146_v40 = vmul.f32 0.7978846, %v142_v38 }
  0xec   :  { %823 = vtanh.f32 %v148_v39 }
  0xed   :  { %825 = vtanh.f32 %v146_v40 }
  0xf4   :  { %v820_v45 = vpop.eup %819 }
  0xf5   :  { %v822_v46 = vpop.eup %821  ;;  %v155_v48 = vadd.f32 1.0, %v820_v45 }
  0xf6   :  { %v824_v49 = vpop.eup %823  ;;  %v153_v51 = vadd.f32 1.0, %v822_v46 }
  0xf7   :  { %v826_v52 = vpop.eup %825  ;;  %v981_v53 = vmul.f32 %v155_v48, %v127_v47  ;;  %v156_v55 = vadd.f32 1.0, %v824_v49  ;;  %v732_v47 = vld [vmem:[%s1151_s4] ss:$0 sm:$0xff] }
  0xf8   :  { %v154_v58 = vadd.f32 1.0, %v826_v52  ;;  %v986_v59 = vmul.f32 %v153_v51, %v125_v50 }
  0xf9   :  { %v988_v60 = vmul.f32 %v156_v55, %v128_v54  ;;  %v172_v61 = vrot.slane %v981_v53, 4  ;;  %v236_v0 = vrot.slane %v981_v53, 2  ;;  %v199_v1 = vrot.slane %v981_v53, 6 }
  0xfa   :  { %v991_v62 = vmul.f32 %v154_v58, %v126_v57  ;;  %212 = vrot.lane.b32.xlu1 %v986_v59, %s857_s23  ;;  %v169_v63 = vrot.slane %v986_v59, 4  ;;  %v233_v2 = vrot.slane %v986_v59, 2  ;;  %v196_v10 = vrot.slane %v986_v59, 6 }
  0xfb   :  { %v173_v3 = vrot.slane %v988_v60, 4  ;;  %v237_v4 = vrot.slane %v988_v60, 2  ;;  %v200_v6 = vrot.slane %v988_v60, 6  ;;  %v551_v20 = vpack.c.bf16 %v988_v60, %v981_v53 }
  0xfc   :  { %175 = vrot.lane.b32.xlu0 %v169_v63, %s858_s26  ;;  %v170_v7 = vrot.slane %v991_v62, 4  ;;  %v234_v8 = vrot.slane %v991_v62, 2  ;;  %v197_v11 = vrot.slane %v991_v62, 6  ;;  %v550_v19 = vpack.c.bf16 %v991_v62, %v986_v59 }
  0xfd   :  { %v174_v12 = vsel %vm168_vm4, %v172_v61, %v173_v3  ;;  %v238_v13 = vsel %vm232_vm5, %v236_v0, %v237_v4  ;;  %v201_v14 = vsel %vm195_vm6, %v199_v1, %v200_v6 }
  0xfe   :  { %179 = vrot.lane.b32.xlu1 %v172_v61, %s858_s26  ;;  %v171_v15 = vsel %vm168_vm4, %v169_v63, %v170_v7  ;;  %v235_v16 = vsel %vm232_vm5, %v233_v2, %v234_v8  ;;  %v198_v17 = vsel %vm195_vm6, %v196_v10, %v197_v11 }
 0x100   :  { %259 = vrot.lane.b32.xlu0 %v170_v7, %s858_s26 }
 0x102   :  { %214 = vrot.lane.b32.xlu1 %v991_v62, %s857_s23 }
 0x104   :  { %241 = vrot.lane.b32.xlu0 %v234_v8, %s859_s30 }
 0x106   :  { %216 = vrot.lane.b32.xlu1 %v981_v53, %s857_s23 }
 0x108   :  { %177 = vrot.lane.b32.xlu0 %v171_v15, %s858_s26  ;;  %v1098_v15 = vld [vmem:[%s1155_s8] sm:$0xff]  }
 0x10a   :  { %239 = vrot.lane.b32.xlu1 %v235_v16, %s859_s30 }
 0x10c   :  { %181 = vrot.lane.b32.xlu0 %v174_v12, %s858_s26 }
 0x10e   :  { %261 = vrot.lane.b32.xlu1 %v173_v3, %s858_s26 }
 0x110   :  { %218 = vrot.lane.b32.xlu0 %v988_v60, %s857_s23 }
 0x112   :  { %245 = vrot.lane.b32.xlu1 %v237_v4, %s859_s30 }
 0x114   :  { %243 = vrot.lane.b32.xlu0 %v238_v13, %s859_s30  ;;  %v815_v13 = vld [vmem:[%s1156_s9] sm:$0xff]  }
 0x115   :  { %775 = vmatprep.subr.bf16.mxu0 %v815_v13 }
 0x116   :  { %776 = vmatpush3.bf16.msra.mxu0 %v815_v13 }
 0x16c   :  { %v213_v9 = vpop.permute.xlu1 %212 }
 0x16e   :  { %v176_v22 = vpop.permute.xlu0 %175 }
 0x16f   :  { %188 = vst.msk [vmem:[#allocation2] sm:$0xf0] %vm187_vm2, %v176_v22 }
 0x170   :  { %207 = vst.msk [vmem:[#allocation2] sm:$0xfc] %vm206_vm7, %v196_v10  ;;  %v180_v23 = vpop.permute.xlu1 %179 }
 0x171   :  { %190 = vst.msk [vmem:[#allocation2 + $0x20] sm:$0xf0] %vm187_vm2, %v180_v23 }
 0x172   :  { %225 = vst.msk [vmem:[#allocation2] sm:$0xff] %vm224_vm8, %v213_v9  ;;  %v260_v24 = vpop.permute.xlu0 %259 }
 0x173   :  { %210 = vst.msk [vmem:[#allocation2 + $0x20] sm:$0xfc] %vm206_vm7, %v199_v1 }
 0x174   :  { %266 = vst.msk [vmem:[#allocation2 + $0x18] sm:$0xf] %vm161_vm1, %v260_v24  ;;  %v215_v25 = vpop.permute.xlu1 %214 }
 0x176   :  { %v242_v26 = vpop.permute.xlu0 %241 }
 0x178   :  { %v217_v27 = vpop.permute.xlu1 %216 }
 0x179   :  { %227 = vst.msk [vmem:[#allocation2 + $0x20] sm:$0xff] %vm224_vm8, %v217_v27 }
 0x17a   :  { %v178_v28 = vpop.permute.xlu0 %177 }
 0x17b   :  { %189 = vst.msk [vmem:[#allocation2 + $0x10] sm:$0xff] %vm69_vm0, %v178_v28  ;;  %265 = vst.msk [vmem:[#allocation2 + $0x8] sm:$0xff] %vm69_vm0, %v178_v28  ;;  %v272_v34 = vld [vmem:[#allocation2 + $0x18] sm:$0xff] }
 0x17c   :  { %209 = vst.msk [vmem:[#allocation2 + $0x10] sm:$0xff] %vm208_vm9, %v198_v17  ;;  %v240_v29 = vpop.permute.xlu1 %239 }
 0x17d   :  { %226 = vst.msk [vmem:[#allocation2 + $0x10] sm:$0xff] %vm224_vm8, %v215_v25 }
 0x17e   :  { %252 = vst.msk [vmem:[#allocation2] sm:$0xff] %vm251_vm10, %v240_v29  ;;  %v182_v30 = vpop.permute.xlu0 %181 }
 0x17f   :  { %230 = vst.msk [vmem:[#allocation2 + $0x10] sm:$0xc0] %vm229_vm11, %v856_v42 }
 0x180   :  { %254 = vst.msk [vmem:[#allocation2 + $0x10] sm:$0x3f] %vm253_vm12, %v242_v26  ;;  %v262_v31 = vpop.permute.xlu1 %261 }
 0x181   :  { %191 = vst.msk [vmem:[#allocation2 + $0x30] sm:$0xff] %vm69_vm0, %v182_v30  ;;  %267 = vst.msk [vmem:[#allocation2 + $0x28] sm:$0xff] %vm69_vm0, %v182_v30 }
 0x182   :  { %211 = vst.msk [vmem:[#allocation2 + $0x30] sm:$0xff] %vm208_vm9, %v201_v14  ;;  %v219_v32 = vpop.permute.xlu0 %218  ;;  %v270_v33 = vld [vmem:[#allocation2 + $0x8] sm:$0xff] }
 0x183   :  { %268 = vst.msk [vmem:[#allocation2 + $0x38] sm:$0xf] %vm161_vm1, %v262_v31  ;;  %v278_v35 = vpack.c.bf16 %v272_v34, %v270_v33  ;;  %v816_v14 = vld [vmem:[%s1156_s9 + $0x8] sm:$0xff]  }
 0x184   :  { %228 = vst.msk [vmem:[#allocation2 + $0x30] sm:$0xff] %vm224_vm8, %v219_v32  ;;  %v246_v36 = vpop.permute.xlu1 %245  ;;  %777 = vmatprep.subr.bf16.mxu0 %v816_v14 }
 0x185   :  { %231 = vst.msk [vmem:[#allocation2 + $0x30] sm:$0xc0] %vm229_vm11, %v856_v42  ;;  %v269_v37 = vld [vmem:[#allocation2] sm:$0xff]  ;;  %743 = vmatprep.mubr.msk.bf16.mxu1 %vm69_vm0, %v278_v35  ;;  %778 = vmatpush3.bf16.msra.mxu0 %v816_v14 }
 0x186   :  { %256 = vst.msk [vmem:[#allocation2 + $0x30] sm:$0x3f] %vm253_vm12, %v246_v36  ;;  %v244_v39 = vpop.permute.xlu0 %243  ;;  %783 = vmatprep.subr.bf16.mxu0 %v1098_v15  ;;  %v494_v14 = vld [vmem:[%s1153_s6] sm:$0x1] }
 0x187   :  { %v271_v38 = vld [vmem:[#allocation2 + $0x10] sm:$0xff]  ;;  %255 = vst.msk [vmem:[#allocation2 + $0x20] sm:$0xff] %vm251_vm10, %v244_v39 }
 0x188   :  { %v277_v40 = vpack.c.bf16 %v271_v38, %v269_v37  ;;  %v274_v41 = vld [vmem:[#allocation2 + $0x28] sm:$0xff] }
 0x18a   :  { %407 = vmatmul.mubr.bf16.vlgmr.msra.gmra.mrb[0].mxu1 %v277_v40  ;;  %v276_v43 = vld [vmem:[#allocation2 + $0x38] sm:$0xff] }
 0x18b   :  { %v280_v44 = vpack.c.bf16 %v276_v43, %v274_v41 }
 0x18d   :  { %744 = vmatprep.mubr.msk.bf16.mxu1 %vm69_vm0, %v280_v44  ;;  %v275_v46 = vld [vmem:[#allocation2 + $0x30] sm:$0xff] }
 0x18e   :  { %v273_v45 = vld [vmem:[#allocation2 + $0x20] sm:$0xff] }
 0x18f   :  { %v279_v42 = vpack.c.bf16 %v275_v46, %v273_v45 }
 0x192   :  { %415 = vmatmul.mubr.bf16.gmra.mrb[4].mxu1 %v279_v42 }
 0x25d   :  { %v408_v48 = vpop.f32.mrb[0].mxu1 }
 0x25e   :  { %v1061_v49 = vadd.f32 %v732_v47, %v408_v48  ;;  %v410_v50 = vpop.f32.mrb[1].mxu1 }
 0x25f   :  { %v411_v51 = vpop.f32.mrb[2].mxu1 }
 0x260   :  { %v1063_v52 = vadd.f32 %v732_v47, %v411_v51  ;;  %v413_v54 = vpop.f32.mrb[3].mxu1  ;;  %v423_v55 = vsel %vm69_vm0, %v1061_v49, 0.0  ;;  %v449_v58 = vmul.f32 %v1061_v49, %v1061_v49 }
 0x261   :  { %424 = vadd.xlane.f32.xlu0 %v423_v55 }
 0x262   :  { %v426_v56 = vsel %vm69_vm0, %v1063_v52, 0.0  ;;  %v450_v57 = vmul.f32 %v1063_v52, %v1063_v52  ;;  %v453_v0 = vsel %vm69_vm0, %v449_v58, 0.0 }
 0x263   :  { %427 = vadd.xlane.f32.xlu1 %v426_v56 }
 0x264   :  { %v456_v61 = vsel %vm69_vm0, %v450_v57, 0.0 }
 0x265   :  { %457 = vadd.xlane.f32.xlu0 %v456_v61  ;;  %v416_v63 = vpop.f32.mrb[4].mxu1 }
 0x266   :  { %v1075_v1 = vadd.f32 %v732_v47, %v416_v63  ;;  %v418_v2 = vpop.f32.mrb[5].mxu1 }
 0x267   :  { %454 = vadd.xlane.f32.xlu1 %v453_v0  ;;  %v419_v3 = vpop.f32.mrb[6].mxu1  ;;  %v501_v0 = vlaneseq }
 0x268   :  { %v1077_v4 = vadd.f32 %v732_v47, %v419_v3  ;;  %v421_v5 = vpop.f32.mrb[7].mxu1  ;;  %v429_v6 = vsel %vm69_vm0, %v1075_v1, 0.0  ;;  %v451_v7 = vmul.f32 %v1075_v1, %v1075_v1 }
 0x269   :  { %430 = vadd.xlane.f32.xlu0 %v429_v6  ;;  %v502_v6 = vshrl.u32 %v501_v0, 7 }
 0x26a   :  { %v459_v8 = vsel %vm69_vm0, %v451_v7, 0.0  ;;  %v432_v10 = vsel %vm69_vm0, %v1077_v4, 0.0  ;;  %v452_v11 = vmul.f32 %v1077_v4, %v1077_v4 }
 0x26b   :  { %460 = vadd.xlane.f32.xlu1 %v459_v8  ;;  %v491_v8 = vld [vmem:[%s1152_s5] sm:$0x1] }
 0x26c   :  { %v462_v12 = vsel %vm69_vm0, %v452_v11, 0.0  ;;  %v503_v11 = vsub.s32 0, %v502_v6 }
 0x26d   :  { %433 = vadd.xlane.f32.xlu0 %v432_v10 }
 0x271   :  { %463 = vadd.xlane.f32.xlu0 %v462_v12 }
 0x2ee   :  { %v425_v16 = vpop.xlane.xlu0 %424 }
 0x2f0   :  { %v428_v17 = vpop.xlane.xlu1 %427 }
 0x2f1   :  { %v435_v18 = vadd.f32 %v428_v17, %v425_v16 }
 0x2f2   :  { %v458_v21 = vpop.xlane.xlu0 %457 }
 0x2f3   :  { %v436_v9 = vrot.slane %v435_v18, 4 }
 0x2f4   :  { %v455_v22 = vpop.xlane.xlu1 %454 }
 0x2f5   :  { %v437_v23 = vadd.f32 %v436_v9, %v435_v18  ;;  %v465_v24 = vadd.f32 %v458_v21, %v455_v22 }
 0x2f6   :  { %v431_v27 = vpop.xlane.xlu0 %430 }
 0x2f7   :  { %v438_v25 = vrot.slane %v437_v23, 2  ;;  %v466_v26 = vrot.slane %v465_v24, 4 }
 0x2f8   :  { %v461_v39 = vpop.xlane.xlu1 %460 }
 0x2f9   :  { %v439_v28 = vadd.f32 %v438_v25, %v437_v23  ;;  %v467_v29 = vadd.f32 %v466_v26, %v465_v24  ;;  %v745_v23 = vld [vmem:[%s1154_s7] ss:$0 sm:$0xff] }
 0x2fa   :  { %v434_v32 = vpop.xlane.xlu0 %433 }
 0x2fb   :  { %v440_v30 = vrot.slane %v439_v28, 1  ;;  %v468_v31 = vrot.slane %v467_v29, 2  ;;  %v442_v33 = vadd.f32 %v434_v32, %v431_v27 }
 0x2fd   :  { %v441_v34 = vadd.f32 %v440_v30, %v439_v28  ;;  %v469_v35 = vadd.f32 %v468_v31, %v467_v29  ;;  %v443_v36 = vrot.slane %v442_v33, 4 }
 0x2fe   :  { %v464_v40 = vpop.xlane.xlu0 %463 }
 0x2ff   :  { %v479_v37 = vmul.f32 0.001953125, %v441_v34  ;;  %v470_v38 = vrot.slane %v469_v35, 1  ;;  %v444_v41 = vadd.f32 %v443_v36, %v442_v33  ;;  %v472_v43 = vadd.f32 %v464_v40, %v461_v39 }
 0x301   :  { %v471_v44 = vadd.f32 %v470_v38, %v469_v35  ;;  %v445_v45 = vrot.slane %v444_v41, 2  ;;  %v473_v46 = vrot.slane %v472_v43, 4  ;;  %v483_v42 = vmul.f32 %v479_v37, %v479_v37 }
 0x303   :  { %v481_v47 = vmul.f32 0.001953125, %v471_v44  ;;  %v446_v48 = vadd.f32 %v445_v45, %v444_v41  ;;  %v474_v50 = vadd.f32 %v473_v46, %v472_v43  ;;  %v818_v45 = vld [vmem:[%s1155_s8 + $0x8] sm:$0xff]   ;;  %s860_s8 = smov [#allocation3]  }
 0x304   :  { %s716_s22 = sshll.u32 %s860_s8, 4  ;;  %s717_s22 = int_to_ptr.vmem [resolvable:$true] %s716_s22 }
 0x305   :  { %v485_v51 = vsub.f32 %v481_v47, %v483_v42  ;;  %v447_v54 = vrot.slane %v446_v48, 1  ;;  %v475_v55 = vrot.slane %v474_v50, 2  ;;  %p836_p1 = scmp.lt.s32.totalorder %s717_s22, %s717_s22 }
 0x307   :  { %v487_v56 = vadd.f32 1e-05, %v485_v51  ;;  %v448_v57 = vadd.f32 %v447_v54, %v446_v48  ;;  %v476_v58 = vadd.f32 %v475_v55, %v474_v50 }
 0x309   :  { %827 = vrsqrt.f32 %v487_v56  ;;  %v480_v61 = vmul.f32 0.001953125, %v448_v57  ;;  %v477_v63 = vrot.slane %v476_v58, 1 }
 0x30b   :  { %v478_v2 = vadd.f32 %v477_v63, %v476_v58  ;;  %v484_v3 = vmul.f32 %v480_v61, %v480_v61 }
 0x30d   :  { %v482_v5 = vmul.f32 0.001953125, %v478_v2 }
 0x30f   :  { %v486_v7 = vsub.f32 %v482_v5, %v484_v3 }
 0x311   :  { %v488_v10 = vadd.f32 1e-05, %v486_v7 }
 0x313   :  { %v828_v12 = vpop.eup %827  ;;  %829 = vrsqrt.f32 %v488_v10 }
 0x314   :  { %v492_v13 = vmul.f32 %v828_v12, %v491_v8 }
 0x316   :  { %v495_v16 = vmul.f32 %v492_v13, %v479_v37  ;;  %v504_v17 = vrot.slane %v492_v13, %v503_v11 }
 0x318   :  { %v497_v18 = vsub.f32 %v494_v14, %v495_v16  ;;  %v511_v21 = vmul.f32 %v504_v17, %v1061_v49  ;;  %v512_v9 = vmul.f32 %v504_v17, %v1063_v52 }
 0x31a   :  { %v520_v22 = vrot.slane %v497_v18, %v503_v11 }
 0x31c   :  { %v527_v24 = vadd.f32 %v520_v22, %v511_v21  ;;  %v528_v25 = vadd.f32 %v520_v22, %v512_v9 }
 0x31d   :  { %v830_v26 = vpop.eup %829 }
 0x31e   :  { %vm531_vm13 = vcmp.ge.f32.partialorder %v527_v24, 0.0  ;;  %vm532_vm14 = vcmp.ge.f32.partialorder %v528_v25, 0.0  ;;  %v542_v27 = vmul.f32 %v745_v23, %v527_v24  ;;  %v543_v28 = vmul.f32 %v745_v23, %v528_v25 }
 0x31f   :  { %v493_v29 = vmul.f32 %v830_v26, %v491_v8 }
 0x320   :  { %v546_v30 = vsel %vm531_vm13, %v527_v24, %v542_v27  ;;  %v547_v31 = vsel %vm532_vm14, %v528_v25, %v543_v28 }
 0x321   :  { %v496_v32 = vmul.f32 %v493_v29, %v480_v61  ;;  %v556_v33 = vpack.c.bf16 %v547_v31, %v546_v30  ;;  %v508_v49 = vrot.slane %v493_v29, %v503_v11 }
 0x323   :  { %v498_v34 = vsub.f32 %v494_v14, %v496_v32  ;;  %779 = vmatprep.mubr.msk.bf16.mxu0 %vm69_vm0, %v556_v33  ;;  %v513_v52 = vmul.f32 %v508_v49, %v1075_v1  ;;  %v514_v35 = vmul.f32 %v508_v49, %v1077_v4  ;;  %v754_v1 = vld [vmem:[%s1157_s10] ss:$0 sm:$0xff]  ;;  %s831_s10 = scalar_lea.vmem %s717_s22, 512 }
 0x324   :  { %p832_p0 = scmp.ne.s32.totalorder %s717_s22, %s831_s10  ;;  %p837_p2 = scmp.lt.s32.totalorder %s831_s10, %s831_s10 }
 0x325   :  { %v524_v36 = vrot.slane %v498_v34, %v503_v11 }
 0x326   :  { %p838_p3 = por %p837_p2, %p836_p1 }
 0x327   :  { %v529_v37 = vadd.f32 %v524_v36, %v513_v52  ;;  %v530_v38 = vadd.f32 %v524_v36, %v514_v35 }
 0x328   :  { %p839_p4 = pnand %p838_p3, %p832_p0 }
 0x329   :  { %vm533_vm15 = vcmp.ge.f32.partialorder %v529_v37, 0.0  ;;  %vm534_vm1 = vcmp.ge.f32.partialorder %v530_v38, 0.0  ;;  %v544_v39 = vmul.f32 %v745_v23, %v529_v37  ;;  %v545_v40 = vmul.f32 %v745_v23, %v530_v38 }
 0x32b   :  { %v548_v41 = vsel %vm533_vm15, %v529_v37, %v544_v39  ;;  %v549_v43 = vsel %vm534_vm1, %v530_v38, %v545_v40 }
 0x32c   :  { %v557_v44 = vpack.c.bf16 %v549_v43, %v548_v41 }
 0x32e   :  { %780 = vmatmul.mubr.msk.bf16.vlgmr.msra.gmra.mrb[4].mxu0 %vm69_vm0, %v557_v44 }
 0x32f   :  { %784 = vmatpush3.bf16.msra.mxu0 %v1098_v15  ;;  %787 = vmatprep.mubr.msk.bf16.mxu0 %vm69_vm0, %v550_v19 }
 0x330   :  { %785 = vmatprep.subr.bf16.mxu0 %v818_v45 }
 0x333   :  { %786 = vmatpush3.bf16.msra.mxu0 %v818_v45 }
 0x33a   :  { %788 = vmatmul.mubr.msk.bf16.vlgmr.msra.gmra.mrb[4].mxu0 %vm69_vm0, %v551_v20 }
 0x40d   :  { %v789_v4 = vpop.f32.mrb[4].mxu0 }
 0x40e   :  { %v705_v46 = vadd.f32 %v789_v4, %v754_v1  ;;  %v681_v42 = vpop.f32.mrb[5].mxu0 }
 0x40f   :  { %v703_v15 = vadd.f32 %v754_v1, %v681_v42  ;;  %v790_v59 = vpop.f32.mrb[6].mxu0 }
 0x410   :  { %709 = vst.msk [vmem:[#allocation3 + $0x10] sm:$0xff] %vm69_vm0, %v705_v46  ;;  %v706_v62 = vadd.f32 %v790_v59, %v754_v1  ;;  %v684_v19 = vpop.f32.mrb[7].mxu0 }
 0x411   :  { %707 = vst.msk [vmem:[#allocation3] sm:$0xff] %vm69_vm0, %v703_v15  ;;  %v704_v53 = vadd.f32 %v754_v1, %v684_v19 }
 0x412   :  { %710 = vst.msk [vmem:[#allocation3 + $0x18] sm:$0xff] %vm69_vm0, %v706_v62 }
 0x413   :  { %708 = vst.msk [vmem:[#allocation3 + $0x8] sm:$0xff] %vm69_vm0, %v704_v53 }
 0x414   :  { %842 = shalt.err (!%p839_p4)
}
 0x415   :  { %s843_s25 = scalar_lea.hbm %s1158_s11, 512 }
 0x416   :  { %p844_p5 = scmp.ne.s32.totalorder %s1158_s11, %s843_s25  ;;  %p847_p6 = scmp.lt.u32.totalorder %s843_s25, %s1158_s11 }
 0x418   :  { %p849_p7 = pnand %p847_p6, %p844_p5 }
 0x41a   :  { %852 = shalt.err (!%p849_p7)
}
 0x41b   :  { %s861_s29 = smov 128   ;;  %s862_s30 = smov 8  }
 0x41c   :  { %722 = dma.vmem_to_hbm [thread:$0]  %s717_s22, 512, %s1158_s11, [#allocation4], %s861_s29, %s861_s29, %s862_s30  }
 0x41d   :  { %853 = dma.done.wait [#allocation4], 512  }
 0x41e   :  { %854 = vsyncadd [#allocation4], 4294966784 }
 0x41f   :  { %726 = vsyncpa [#allocation4], 1 }

</bundles_post_ra>
